<compile_context>
chip_gen: v5e
topology: v5e:2x2
jax: 0.10.0
libtpu: 0.0.40
codegen_flags: <defaults>
</compile_context>

<pallas_src>
import jax
import jax.numpy as jnp
from jax.experimental import pallas as pl
from jax.experimental.pallas import tpu as pltpu


def _make_kernel(S, tile_s, nk, chunk_w, needs_mask, Bb):
    inv_s = 1.0 / float(S)
    n_chunks = tile_s // chunk_w
    assert n_chunks * chunk_w == tile_s

    def kernel(x_ref, w1_ref, w2_ref, out_ref, sum_acc, max_acc):
        # x_ref:   (Bb, C, tile_s)  one spatial tile of Bb batch elements
        # w1_ref:  (Ch, C)   fc1 weight
        # w2_ref:  (C, Ch)   fc2 weight
        # out_ref: (Bb, C, 1) attention map for this batch group
        # sum_acc/max_acc: (Bb, C, chunk_w) f32 running partials (small)
        k = pl.program_id(1)

        @pl.when(k == 0)
        def _init():
            sum_acc[...] = jnp.zeros_like(sum_acc)
            max_acc[...] = jnp.full_like(max_acc, -jnp.inf)

        def accumulate(masked):
            # Unrolled chunk loop: register-local accumulation (VPU only),
            # single scratch RMW per grid step.
            s_loc = None
            m_loc = None
            for j in range(n_chunks):
                xc = x_ref[:, :, j * chunk_w:(j + 1) * chunk_w].astype(jnp.float32)
                if masked:  # only emitted for the partial tail tile
                    col = (k * tile_s + j * chunk_w
                           + jax.lax.broadcasted_iota(jnp.int32, xc.shape, 2))
                    valid = col < S
                    xs = jnp.where(valid, xc, 0.0)
                    xm = jnp.where(valid, xc, -jnp.inf)
                else:
                    xs = xc
                    xm = xc
                s_loc = xs if s_loc is None else s_loc + xs
                m_loc = xm if m_loc is None else jnp.maximum(m_loc, xm)
            sum_acc[...] = sum_acc[...] + s_loc
            max_acc[...] = jnp.maximum(max_acc[...], m_loc)

        if needs_mask:
            # Only the last (partial) tile pays the iota/compare/select cost.
            @pl.when(k == nk - 1)
            def _tail():
                accumulate(masked=True)

            @pl.when(k != nk - 1)
            def _body():
                accumulate(masked=False)
        else:
            accumulate(masked=False)

        @pl.when(k == nk - 1)
        def _finalize():
            # Single small cross-lane reduction, once per batch group.
            avg = jnp.sum(sum_acc[...], axis=-1, keepdims=True) * inv_s  # (Bb,C,1)
            mx = jnp.max(max_acc[...], axis=-1, keepdims=True)           # (Bb,C,1)

            C = avg.shape[1]
            lane = jax.lax.broadcasted_iota(jnp.int32, (C, 2), 1)  # hoisted
            w1 = w1_ref[...]
            w2 = w2_ref[...]
            # Tiny shared MLP (avg & max stacked as two lane-columns), unrolled
            # over the Bb images of this grid step. FLOPs are negligible; runs
            # once per batch group. Default MXU precision; f32 accumulation.
            for b in range(Bb):
                pooled = jnp.where(lane == 0, avg[b], mx[b])             # (C, 2)
                h = jnp.dot(w1, pooled, preferred_element_type=jnp.float32)  # (Ch,2)
                h = jnp.maximum(h, 0.0)                                  # ReLU
                y = jnp.dot(w2, h, preferred_element_type=jnp.float32)   # (C, 2)
                att = jax.nn.sigmoid(y[:, 0:1] + y[:, 1:2])              # (C, 1)
                out_ref[b] = att.astype(out_ref.dtype)

    return kernel


def channel_attention(x_nchw, w1, w2, *, tile_s=None, batch_block=None):
    """x_nchw: (B, C, H, W); w1: (Ch, C) fc1 weight; w2: (C, Ch) fc2 weight.
    Returns the (B, C, 1, 1) channel-attention map (sigmoid output)."""
    B, C, H, W = x_nchw.shape
    Ch = w1.shape[0]
    S = H * W
    itemsize = x_nchw.dtype.itemsize

    # Free reshape, no transpose: channels on sublanes, spatial on lanes.
    x_bcs = x_nchw.reshape(B, C, S)

    # ---- Per-generation VMEM budget (honest accounting) --------------------
    try:
        vmem_cap = int(pltpu.get_tpu_info().vmem_capacity_bytes)
    except Exception:  # pragma: no cover - fallback if query unavailable
        vmem_cap = 64 * 1024 * 1024  # conservative (v7x per-TC physical)
    vmem_limit = max(32 << 20, int(vmem_cap * 0.75))  # ~48 MiB v7x, ~96 MiB v5e/v6e
    weight_bytes = 2 * 2 * Ch * C * w1.dtype.itemsize  # w1+w2, double-buffered
    usable = vmem_limit - weight_bytes - (1 << 20)      # slack for out blocks/misc

    MAX_TILE_BYTES = 8 << 20   # per streamed buffer (amortizes ~0.35us/step on v7x)
    MAX_LANES = 16384          # bounds the unrolled chunk loop (<= 128 chunks)
    MAX_BB = 8                 # bounds the unrolled epilogue MLP loop

    # ---- Spatial tile selection --------------------------------------------
    if tile_s is None:
        img_bytes = C * S * itemsize
        acc_w_if_whole = 128 if S % 128 == 0 else S
        per_img_vmem = 2 * img_bytes + 2 * C * acc_w_if_whole * 4
        if img_bytes <= MAX_TILE_BYTES and S <= MAX_LANES and per_img_vmem <= usable:
            tile_s = S                                   # whole image per step
        else:
            # 2x double-buffered tile + 2 f32 (C,128) accumulators must fit.
            max_tile_bytes = min(MAX_TILE_BYTES, max(0, usable - 2 * C * 128 * 4) // 2)
            tile_s = (max_tile_bytes // (C * itemsize)) // 128 * 128
            tile_s = int(max(128, min(tile_s, MAX_LANES)))
            tile_s = min(tile_s, S)
    else:
        tile_s = int(tile_s)
        if tile_s >= S:
            tile_s = S
        else:
            tile_s = max(128, (tile_s // 128) * 128)     # lane-aligned streaming tile
    tile_s = int(min(tile_s, S))

    nk = -(-S // tile_s)
    needs_mask = (S % tile_s) != 0                       # only possible when nk > 1
    chunk_w = 128 if (tile_s % 128 == 0) else tile_s     # non-128 only when tile_s == S

    # ---- Fold several tiny images into one grid step (amortize step cost) --
    if batch_block is not None:
        Bb = max(1, int(batch_block))
        assert B % Bb == 0, "batch_block must divide B"
    elif nk == 1:
        per_img = 2 * C * tile_s * itemsize + 2 * C * chunk_w * 4
        max_bb = int(min(B, MAX_BB,
                         max(1, usable // max(per_img, 1)),
                         max(1, MAX_TILE_BYTES // max(C * tile_s * itemsize, 1))))
        Bb = 1
        for cand in range(max_bb, 0, -1):
            if B % cand == 0:
                Bb = cand
                break
    else:
        Bb = 1

    kernel = _make_kernel(S, tile_s, nk, chunk_w, needs_mask, Bb)

    out_bc1 = pl.pallas_call(
        kernel,
        out_shape=jax.ShapeDtypeStruct((B, C, 1), x_nchw.dtype),
        grid_spec=pltpu.PrefetchScalarGridSpec(
            num_scalar_prefetch=0,
            grid=(B // Bb, nk),
            in_specs=[
                pl.BlockSpec((Bb, C, tile_s), lambda b, k: (b, 0, k)),
                pl.BlockSpec((Ch, C), lambda b, k: (0, 0)),
                pl.BlockSpec((C, Ch), lambda b, k: (0, 0)),
            ],
            out_specs=pl.BlockSpec((Bb, C, 1), lambda b, k: (b, 0, 0)),
            scratch_shapes=[
                pltpu.VMEM((Bb, C, chunk_w), jnp.float32),  # running sum partials
                pltpu.VMEM((Bb, C, chunk_w), jnp.float32),  # running max partials
            ],
        ),
        compiler_params=pltpu.CompilerParams(
            dimension_semantics=("parallel", "arbitrary"),
            vmem_limit_bytes=int(vmem_limit),
        ),
    )(x_bcs, w1, w2)

    return out_bc1.reshape(B, C, 1, 1)


def _reference(x_nchw, w1, w2):
    """Pure-JAX reference mirroring the PyTorch forward."""
    avg = jnp.mean(x_nchw, axis=(2, 3))  # (B, C)
    mx = jnp.max(x_nchw, axis=(2, 3))    # (B, C)

    def mlp(v):
        h = jnp.maximum(
            jnp.dot(v, w1.T, precision=jax.lax.Precision.HIGHEST), 0.0)
        return jnp.dot(h, w2.T, precision=jax.lax.Precision.HIGHEST)

    out = jax.nn.sigmoid(mlp(avg) + mlp(mx))
    return out.reshape(*out.shape, 1, 1)


if __name__ == "__main__":
    key = jax.random.PRNGKey(0)
    kx1, kx2, k1, k2 = jax.random.split(key, 4)

    B, C = 2, 32          # in_planes must be >= 16 (fc1 hard-codes C // 16 channels)
    Ch = C // 16

    w1 = jax.random.normal(k1, (Ch, C), dtype=jnp.float32) * (2.0 / C) ** 0.5
    w2 = jax.random.normal(k2, (C, Ch), dtype=jnp.float32) * (2.0 / max(Ch, 1)) ** 0.5

    x1 = jax.random.normal(kx1, (B, C, 16, 16), dtype=jnp.float32)   # S = 256
    x2 = jax.random.normal(kx2, (B, C, 12, 12), dtype=jnp.float32)   # S = 144

    # 1) Auto config: whole image per step, Bb images folded per grid step.
    out1 = channel_attention(x1, w1, w2)
    # 2) Forced streaming with a ragged tail: nk = 2, mask only on the last tile.
    out2 = channel_attention(x2, w1, w2, tile_s=128)
    # 3) Forced streaming, exact tiles: nk = 2, unmasked multi-step accumulation.
    out3 = channel_attention(x1, w1, w2, tile_s=128)
    jax.block_until_ready((out1, out2, out3))

    ref1 = _reference(x1, w1, w2)
    ref2 = _reference(x2, w1, w2)

    assert out1.shape == (B, C, 1, 1) and out2.shape == (B, C, 1, 1)
    assert jnp.allclose(out1, ref1, atol=1e-5, rtol=1e-5), "case 1 mismatch vs reference"
    assert jnp.allclose(out2, ref2, atol=1e-5, rtol=1e-5), "case 2 mismatch vs reference"
    assert jnp.allclose(out3, ref1, atol=1e-5, rtol=1e-5), "case 3 mismatch vs reference"

    print("KERNEL_OK")
</pallas_src>

<mosaic_0001>
module attributes {stable_mosaic.version = 11 : i64} {
  func.func @kernel(%arg0: i32, %arg1: i32, %arg2: memref<2x32x256xf32, #tpu.memory_space<vmem>>, %arg3: memref<2x32xf32, #tpu.memory_space<vmem>>, %arg4: memref<32x2xf32, #tpu.memory_space<vmem>>, %arg5: memref<2x32x1xf32, #tpu.memory_space<vmem>>, %arg6: memref<2x32x128xf32, #tpu.memory_space<vmem>>, %arg7: memref<2x32x128xf32, #tpu.memory_space<vmem>>) attributes {dimension_semantics = [#tpu.dimension_semantics<parallel>, #tpu.dimension_semantics<arbitrary>], iteration_bounds = array<i64: 1, 1>, scalar_prefetch = 0 : i64, scratch_operands = 2 : i64, tpu.core_type = #tpu.core_type<tc>, window_params = [{transform_indices = @transform_0, window_bounds = array<i64: 2, 32, 256>}, {pipeline_mode = #tpu.pipeline_mode<synchronous>, transform_indices = @transform_1, window_bounds = array<i64: 2, 32>}, {pipeline_mode = #tpu.pipeline_mode<synchronous>, transform_indices = @transform_2, window_bounds = array<i64: 32, 2>}, {transform_indices = @transform_3, window_bounds = array<i64: 2, 32, 1>}]} {
    %c0_i32 = arith.constant 0 : i32
    %0 = arith.cmpi eq, %arg1, %c0_i32 : i32
    %1 = arith.extui %0 : i1 to i32
    %c0_i32_0 = arith.constant 0 : i32
    %2 = arith.cmpi ne, %1, %c0_i32_0 : i32
    scf.if %2 {
      %cst = arith.constant 0.000000e+00 : f32
      %16 = vector.broadcast %cst : f32 to vector<2x32x128xf32>
      %c0_19 = arith.constant 0 : index
      %c0_20 = arith.constant 0 : index
      %c0_21 = arith.constant 0 : index
      %17 = vector.load %arg6[%c0_19, %c0_20, %c0_21] : memref<2x32x128xf32, #tpu.memory_space<vmem>>, vector<2x32x128xf32>
      tpu.vector_store %arg6[%c0_19, %c0_20, %c0_21], %16 {strides = array<i32>} : memref<2x32x128xf32, #tpu.memory_space<vmem>>, vector<2x32x128xf32>,
      %cst_22 = arith.constant 0xFF800000 : f32
      %18 = vector.broadcast %cst_22 : f32 to vector<2x32x128xf32>
      %c0_23 = arith.constant 0 : index
      %c0_24 = arith.constant 0 : index
      %c0_25 = arith.constant 0 : index
      %19 = vector.load %arg7[%c0_23, %c0_24, %c0_25] : memref<2x32x128xf32, #tpu.memory_space<vmem>>, vector<2x32x128xf32>
      tpu.vector_store %arg7[%c0_23, %c0_24, %c0_25], %18 {strides = array<i32>} : memref<2x32x128xf32, #tpu.memory_space<vmem>>, vector<2x32x128xf32>,
    } else {
    }
    %c0 = arith.constant 0 : index
    %c0_1 = arith.constant 0 : index
    %c0_2 = arith.constant 0 : index
    %3 = vector.load %arg2[%c0, %c0_1, %c0_2] : memref<2x32x256xf32, #tpu.memory_space<vmem>>, vector<2x32x128xf32>
    %c0_3 = arith.constant 0 : index
    %c0_4 = arith.constant 0 : index
    %c128 = arith.constant 128 : index
    %4 = vector.load %arg2[%c0_3, %c0_4, %c128] : memref<2x32x256xf32, #tpu.memory_space<vmem>>, vector<2x32x128xf32>
    %5 = arith.addf %3, %4 : vector<2x32x128xf32>
    %6 = arith.maximumf %3, %4 : vector<2x32x128xf32>
    %c0_5 = arith.constant 0 : index
    %c0_6 = arith.constant 0 : index
    %c0_7 = arith.constant 0 : index
    %7 = vector.load %arg6[%c0_5, %c0_6, %c0_7] : memref<2x32x128xf32, #tpu.memory_space<vmem>>, vector<2x32x128xf32>
    %8 = arith.addf %7, %5 : vector<2x32x128xf32>
    %c0_8 = arith.constant 0 : index
    %c0_9 = arith.constant 0 : index
    %c0_10 = arith.constant 0 : index
    %9 = vector.load %arg6[%c0_8, %c0_9, %c0_10] : memref<2x32x128xf32, #tpu.memory_space<vmem>>, vector<2x32x128xf32>
    tpu.vector_store %arg6[%c0_8, %c0_9, %c0_10], %8 {strides = array<i32>} : memref<2x32x128xf32, #tpu.memory_space<vmem>>, vector<2x32x128xf32>,
    %c0_11 = arith.constant 0 : index
    %c0_12 = arith.constant 0 : index
    %c0_13 = arith.constant 0 : index
    %10 = vector.load %arg7[%c0_11, %c0_12, %c0_13] : memref<2x32x128xf32, #tpu.memory_space<vmem>>, vector<2x32x128xf32>
    %11 = arith.maximumf %10, %6 : vector<2x32x128xf32>
    %c0_14 = arith.constant 0 : index
    %c0_15 = arith.constant 0 : index
    %c0_16 = arith.constant 0 : index
    %12 = vector.load %arg7[%c0_14, %c0_15, %c0_16] : memref<2x32x128xf32, #tpu.memory_space<vmem>>, vector<2x32x128xf32>
    tpu.vector_store %arg7[%c0_14, %c0_15, %c0_16], %11 {strides = array<i32>} : memref<2x32x128xf32, #tpu.memory_space<vmem>>, vector<2x32x128xf32>,
    %c0_i32_17 = arith.constant 0 : i32
    %13 = arith.cmpi eq, %arg1, %c0_i32_17 : i32
    %14 = arith.extui %13 : i1 to i32
    %c0_i32_18 = arith.constant 0 : i32
    %15 = arith.cmpi ne, %14, %c0_i32_18 : i32
    scf.if %15 {
      %c0_19 = arith.constant 0 : index
      %c0_20 = arith.constant 0 : index
      %c0_21 = arith.constant 0 : index
      %16 = vector.load %arg6[%c0_19, %c0_20, %c0_21] : memref<2x32x128xf32, #tpu.memory_space<vmem>>, vector<2x32x128xf32>
      %cst = arith.constant dense<0.000000e+00> : vector<2x32xf32>
      %17 = vector.multi_reduction <add>, %16, %cst [2] : vector<2x32x128xf32> to vector<2x32xf32>
      %18 = vector.shape_cast %17 : vector<2x32xf32> to vector<2x32x1xf32>
      %cst_22 = arith.constant 3.906250e-03 : f32
      %19 = vector.broadcast %cst_22 : f32 to vector<2x32x1xf32>
      %20 = arith.mulf %18, %19 : vector<2x32x1xf32>
      %c0_23 = arith.constant 0 : index
      %c0_24 = arith.constant 0 : index
      %c0_25 = arith.constant 0 : index
      %21 = vector.load %arg7[%c0_23, %c0_24, %c0_25] : memref<2x32x128xf32, #tpu.memory_space<vmem>>, vector<2x32x128xf32>
      %cst_26 = arith.constant dense<0xFF800000> : vector<2x32xf32>
      %22 = vector.multi_reduction <maximumf>, %21, %cst_26 [2] : vector<2x32x128xf32> to vector<2x32xf32>
      %23 = vector.shape_cast %22 : vector<2x32xf32> to vector<2x32x1xf32>
      %24 = tpu.iota {dimensions = array<i32: 1>} : vector<32x2xi32>
      %c0_27 = arith.constant 0 : index
      %c0_28 = arith.constant 0 : index
      %25 = vector.load %arg3[%c0_27, %c0_28] : memref<2x32xf32, #tpu.memory_space<vmem>>, vector<2x32xf32>
      %c0_29 = arith.constant 0 : index
      %c0_30 = arith.constant 0 : index
      %26 = vector.load %arg4[%c0_29, %c0_30] : memref<32x2xf32, #tpu.memory_space<vmem>>, vector<32x2xf32>
      %c0_i32_31 = arith.constant 0 : i32
      %27 = vector.broadcast %c0_i32_31 : i32 to vector<32x2xi32>
      %28 = arith.cmpi eq, %24, %27 : vector<32x2xi32>
      %29 = vector.extract_strided_slice %20 {offsets = [0, 0, 0], sizes = [1, 32, 1], strides = [1, 1, 1]} : vector<2x32x1xf32> to vector<1x32x1xf32>
      %30 = vector.shape_cast %29 : vector<1x32x1xf32> to vector<32x1xf32>
      %31 = vector.extract_strided_slice %23 {offsets = [0, 0, 0], sizes = [1, 32, 1], strides = [1, 1, 1]} : vector<2x32x1xf32> to vector<1x32x1xf32>
      %32 = vector.shape_cast %31 : vector<1x32x1xf32> to vector<32x1xf32>
      %33 = vector.shape_cast %30 : vector<32x1xf32> to vector<32x1xf32>
      %34 = vector.broadcast %33 : vector<32x1xf32> to vector<32x2xf32>
      %35 = vector.shape_cast %32 : vector<32x1xf32> to vector<32x1xf32>
      %36 = vector.broadcast %35 : vector<32x1xf32> to vector<32x2xf32>
      %37 = arith.select %28, %34, %36 : vector<32x2xi1>, vector<32x2xf32>
      %cst_32 = arith.constant dense<0.000000e+00> : vector<2x2xf32>
      %38 = tpu.matmul %25, %37, %cst_32 {dimension_numbers = #tpu.dot_dimension_numbers<[1], [0], [0], [1], [0, 0, 1, 1], [], []>} : vector<2x32xf32>, vector<32x2xf32>, vector<2x2xf32> -> vector<2x2xf32>
      %cst_33 = arith.constant 0.000000e+00 : f32
      %39 = vector.broadcast %cst_33 : f32 to vector<2x2xf32>
      %40 = arith.maximumf %38, %39 : vector<2x2xf32>
      %cst_34 = arith.constant dense<0.000000e+00> : vector<32x2xf32>
      %41 = tpu.matmul %26, %40, %cst_34 {dimension_numbers = #tpu.dot_dimension_numbers<[1], [0], [0], [1], [0, 0, 1, 1], [], []>} : vector<32x2xf32>, vector<2x2xf32>, vector<32x2xf32> -> vector<32x2xf32>
      %42 = vector.extract_strided_slice %41 {offsets = [0, 0], sizes = [32, 1], strides = [1, 1]} : vector<32x2xf32> to vector<32x1xf32>
      %43 = vector.extract_strided_slice %41 {offsets = [0, 1], sizes = [32, 1], strides = [1, 1]} : vector<32x2xf32> to vector<32x1xf32>
      %44 = arith.addf %42, %43 : vector<32x1xf32>
      %45 = arith.negf %44 : vector<32x1xf32>
      %46 = math.exp %45 : vector<32x1xf32>
      %cst_35 = arith.constant 1.000000e+00 : f32
      %47 = vector.broadcast %cst_35 : f32 to vector<32x1xf32>
      %48 = arith.addf %47, %46 : vector<32x1xf32>
      %49 = arith.divf %47, %48 : vector<32x1xf32>
      %c0_36 = arith.constant 0 : index
      %c0_37 = arith.constant 0 : index
      %c0_38 = arith.constant 0 : index
      %50 = vector.load %arg5[%c0_36, %c0_37, %c0_38] : memref<2x32x1xf32, #tpu.memory_space<vmem>>, vector<1x32x1xf32>
      %51 = vector.shape_cast %50 : vector<1x32x1xf32> to vector<32x1xf32>
      %52 = vector.shape_cast %49 : vector<32x1xf32> to vector<1x32x1xf32>
      tpu.vector_store %arg5[%c0_36, %c0_37, %c0_38], %52 {strides = array<i32>} : memref<2x32x1xf32, #tpu.memory_space<vmem>>, vector<1x32x1xf32>,
      %c0_i32_39 = arith.constant 0 : i32
      %53 = vector.broadcast %c0_i32_39 : i32 to vector<32x2xi32>
      %54 = arith.cmpi eq, %24, %53 : vector<32x2xi32>
      %55 = vector.extract_strided_slice %20 {offsets = [1, 0, 0], sizes = [1, 32, 1], strides = [1, 1, 1]} : vector<2x32x1xf32> to vector<1x32x1xf32>
      %56 = vector.shape_cast %55 : vector<1x32x1xf32> to vector<32x1xf32>
      %57 = vector.extract_strided_slice %23 {offsets = [1, 0, 0], sizes = [1, 32, 1], strides = [1, 1, 1]} : vector<2x32x1xf32> to vector<1x32x1xf32>
      %58 = vector.shape_cast %57 : vector<1x32x1xf32> to vector<32x1xf32>
      %59 = vector.shape_cast %56 : vector<32x1xf32> to vector<32x1xf32>
      %60 = vector.broadcast %59 : vector<32x1xf32> to vector<32x2xf32>
      %61 = vector.shape_cast %58 : vector<32x1xf32> to vector<32x1xf32>
      %62 = vector.broadcast %61 : vector<32x1xf32> to vector<32x2xf32>
      %63 = arith.select %54, %60, %62 : vector<32x2xi1>, vector<32x2xf32>
      %cst_40 = arith.constant dense<0.000000e+00> : vector<2x2xf32>
      %64 = tpu.matmul %25, %63, %cst_40 {dimension_numbers = #tpu.dot_dimension_numbers<[1], [0], [0], [1], [0, 0, 1, 1], [], []>} : vector<2x32xf32>, vector<32x2xf32>, vector<2x2xf32> -> vector<2x2xf32>
      %cst_41 = arith.constant 0.000000e+00 : f32
      %65 = vector.broadcast %cst_41 : f32 to vector<2x2xf32>
      %66 = arith.maximumf %64, %65 : vector<2x2xf32>
      %cst_42 = arith.constant dense<0.000000e+00> : vector<32x2xf32>
      %67 = tpu.matmul %26, %66, %cst_42 {dimension_numbers = #tpu.dot_dimension_numbers<[1], [0], [0], [1], [0, 0, 1, 1], [], []>} : vector<32x2xf32>, vector<2x2xf32>, vector<32x2xf32> -> vector<32x2xf32>
      %68 = vector.extract_strided_slice %67 {offsets = [0, 0], sizes = [32, 1], strides = [1, 1]} : vector<32x2xf32> to vector<32x1xf32>
      %69 = vector.extract_strided_slice %67 {offsets = [0, 1], sizes = [32, 1], strides = [1, 1]} : vector<32x2xf32> to vector<32x1xf32>
      %70 = arith.addf %68, %69 : vector<32x1xf32>
      %71 = arith.negf %70 : vector<32x1xf32>
      %72 = math.exp %71 : vector<32x1xf32>
      %cst_43 = arith.constant 1.000000e+00 : f32
      %73 = vector.broadcast %cst_43 : f32 to vector<32x1xf32>
      %74 = arith.addf %73, %72 : vector<32x1xf32>
      %75 = arith.divf %73, %74 : vector<32x1xf32>
      %c1 = arith.constant 1 : index
      %c0_44 = arith.constant 0 : index
      %c0_45 = arith.constant 0 : index
      %76 = vector.load %arg5[%c1, %c0_44, %c0_45] : memref<2x32x1xf32, #tpu.memory_space<vmem>>, vector<1x32x1xf32>
      %77 = vector.shape_cast %76 : vector<1x32x1xf32> to vector<32x1xf32>
      %78 = vector.shape_cast %75 : vector<32x1xf32> to vector<1x32x1xf32>
      tpu.vector_store %arg5[%c1, %c0_44, %c0_45], %78 {strides = array<i32>} : memref<2x32x1xf32, #tpu.memory_space<vmem>>, vector<1x32x1xf32>,
    } else {
    }
    return
  }
  func.func @transform_0(%arg0: i32, %arg1: i32) -> (i32, i32, i32) {
    %c0_i32 = arith.constant 0 : i32
    %c0_i32_0 = arith.constant 0 : i32
    return %arg0, %c0_i32, %arg1 : i32, i32, i32
  }
  func.func @transform_1(%arg0: i32, %arg1: i32) -> (i32, i32) {
    %c0_i32 = arith.constant 0 : i32
    %c0_i32_0 = arith.constant 0 : i32
    %c0_i32_1 = arith.constant 0 : i32
    return %c0_i32, %c0_i32_0 : i32, i32
  }
  func.func @transform_2(%arg0: i32, %arg1: i32) -> (i32, i32) {
    %c0_i32 = arith.constant 0 : i32
    %c0_i32_0 = arith.constant 0 : i32
    %c0_i32_1 = arith.constant 0 : i32
    return %c0_i32, %c0_i32_0 : i32, i32
  }
  func.func @transform_3(%arg0: i32, %arg1: i32) -> (i32, i32, i32) {
    %c0_i32 = arith.constant 0 : i32
    %c0_i32_0 = arith.constant 0 : i32
    %c0_i32_1 = arith.constant 0 : i32
    return %arg0, %c0_i32, %c0_i32_0 : i32, i32, i32
  }
}

</mosaic_0001>

<bundles_post_ra>
// kernel: tpu_custom_call.1
= control target key start
LH: loop header
LB: loop body
LE: loop exit
PB: predicated region body
PF: predicated region fallthrough
CT: control target
= control target key end

     0   :  { %8 = vsyncpa [#allocation5], 0  ;;  %s624_s15 = smov [#allocation4]   ;;  %s625_s17 = smov 256   ;;  %s738_s0 = inlined_call_operand.hbm [shape: f32[2,32,256], index: 0, kind: input, shape index: {}]   ;;  %s739_s1 = inlined_call_operand.vmem [shape: f32[2,32], index: 1, kind: input, shape index: {}]   ;;  %s740_s2 = inlined_call_operand.vmem [shape: f32[32,2], index: 2, kind: input, shape index: {}]   ;;  %s741_s3 = inlined_call_operand.vmem [shape: f32[2,32,1], index: 3, kind: output, shape index: {}]  }
   0x1   :  { %s13_s14 = sshll.u32 %s738_s0, 4  ;;  %s15_s16 = sshll.u32 %s624_s15, 4  ;;  %s14_s14 = int_to_ptr.hbm [resolvable:$true] %s13_s14  ;;  %s16_s16 = int_to_ptr.vmem [resolvable:$true] %s15_s16 }
   0x2   :  { %s626_s18 = smov 16  }
   0x3   :  { %21 = dma.hbm_to_vmem [thread:$0]  %s14_s14, 2048, %s16_s16, [#allocation5], %s625_s17, %s625_s17, %s626_s18  }
   0x4   :  { %622 = dma.done.wait [#allocation5], 2048  }
   0x5   :  { %623 = vsyncadd [#allocation5], 4294965248  ;;  %v57_v0 = vld [vmem:[#allocation4 + $0x70] sm:$0xff]  ;;  %v65_v1 = vld [vmem:[#allocation4 + $0x78] sm:$0xff]  ;;  %v189_v32 = vlaneseq  ;;  %vm201_vm1 = vcmask 261120   ;;  %vm239_vm2 = vcmask 1041408  }
   0x6   :  { %v56_v2 = vld [vmem:[#allocation4 + $0x60] sm:$0xff]  ;;  %v81_v3 = vmax.f32 %v57_v0, %v65_v1  ;;  %v73_v4 = vadd.f32 %v65_v1, %v57_v0  ;;  %v64_v5 = vld [vmem:[#allocation4 + $0x68] sm:$0xff]  ;;  %v55_v7 = vld [vmem:[#allocation4 + $0x50] sm:$0xff]  ;;  %vm226_vm3 = vcmask 15360   ;;  %s627_s27 = smov 127   ;;  %vm368_vm6 = vcmask 7168  }
   0x7   :  { %v80_v6 = vmax.f32 %v56_v2, %v64_v5  ;;  %v63_v8 = vld [vmem:[#allocation4 + $0x58] sm:$0xff]  ;;  %v54_v9 = vld [vmem:[#allocation4 + $0x40] sm:$0xff]  ;;  %v62_v10 = vld [vmem:[#allocation4 + $0x48] sm:$0xff]  ;;  %v72_v11 = vadd.f32 %v64_v5, %v56_v2  ;;  %v190_v33 = vand.u32 127, %v189_v32 }
   0x8   :  { %187 = vmax.xlane.f32.xlu1 %v81_v3  ;;  %155 = vadd.xlane.f32.xlu0 %v73_v4  ;;  %v71_v12 = vadd.f32 %v63_v8, %v55_v7  ;;  %v70_v13 = vadd.f32 %v62_v10, %v54_v9  ;;  %v53_v14 = vld [vmem:[#allocation4 + $0x30] sm:$0xff]  ;;  %v61_v15 = vld [vmem:[#allocation4 + $0x38] sm:$0xff]  ;;  %v79_v16 = vmax.f32 %v55_v7, %v63_v8  ;;  %v52_v19 = vld [vmem:[#allocation4 + $0x20] sm:$0xff] }
   0x9   :  { %185 = vmax.xlane.f32.xlu2 %v80_v6  ;;  %v78_v17 = vmax.f32 %v54_v9, %v62_v10  ;;  %v69_v18 = vadd.f32 %v61_v15, %v53_v14  ;;  %v60_v20 = vld [vmem:[#allocation4 + $0x28] sm:$0xff]  ;;  %v51_v21 = vld [vmem:[#allocation4 + $0x10] sm:$0xff]  ;;  %v59_v22 = vld [vmem:[#allocation4 + $0x18] sm:$0xff]  ;;  %v77_v23 = vmax.f32 %v53_v14, %v61_v15  ;;  %vm196_vm0 = vcmp.eq.s32.totalorder %v190_v33, 0 }
   0xa   :  { %v68_v24 = vadd.f32 %v60_v20, %v52_v19  ;;  %v67_v25 = vadd.f32 %v59_v22, %v51_v21  ;;  %v50_v26 = vld [vmem:[#allocation4] sm:$0xff]  ;;  %v58_v27 = vld [vmem:[#allocation4 + $0x8] sm:$0xff]  ;;  %v76_v28 = vmax.f32 %v52_v19, %v60_v20  ;;  %v75_v30 = vmax.f32 %v51_v21, %v59_v22  ;;  %v194_v7 = vld [vmem:[%s740_s2 + $0x10] sm:$0xff] }
   0xb   :  { %v66_v29 = vadd.f32 %v58_v27, %v50_v26  ;;  %v74_v31 = vmax.f32 %v50_v26, %v58_v27  ;;  %v191_v50 = vld [vmem:[%s739_s1] sm:$0x3]  ;;  %v193_v5 = vld [vmem:[%s740_s2 + $0x8] sm:$0xff]  ;;  %v195_v10 = vld [vmem:[%s740_s2 + $0x18] sm:$0xff] }
   0xc   :  { %v192_v6 = vld [vmem:[%s740_s2] sm:$0xff] }
  0x10   :  { %153 = vadd.xlane.f32.xlu0 %v72_v11  ;;  %151 = vadd.xlane.f32.xlu1 %v71_v12 }
  0x11   :  { %149 = vadd.xlane.f32.xlu2 %v70_v13 }
  0x18   :  { %183 = vmax.xlane.f32.xlu0 %v79_v16  ;;  %181 = vmax.xlane.f32.xlu1 %v78_v17 }
  0x19   :  { %147 = vadd.xlane.f32.xlu2 %v69_v18 }
  0x20   :  { %179 = vmax.xlane.f32.xlu1 %v77_v23  ;;  %145 = vadd.xlane.f32.xlu0 %v68_v24 }
  0x21   :  { %143 = vadd.xlane.f32.xlu2 %v67_v25 }
  0x28   :  { %177 = vmax.xlane.f32.xlu0 %v76_v28  ;;  %141 = vadd.xlane.f32.xlu1 %v66_v29 }
  0x29   :  { %175 = vmax.xlane.f32.xlu2 %v75_v30 }
  0x30   :  { %173 = vmax.xlane.f32.xlu0 %v74_v31 }
  0x7b   :  { %v188_v34 = vpop.xlane.xlu1 %187  ;;  %v156_v35 = vpop.xlane.xlu0 %155 }
  0x7c   :  { %v164_v36 = vmul.f32 0.00390625, %v156_v35  ;;  %v186_v37 = vpop.xlane.xlu2 %185 }
  0x7e   :  { %v376_v38 = vsel %vm196_vm0, %v164_v36, %v188_v34 }
  0x7f   :  { %389 = vmatpush.msra.mxu2 %v376_v38 }
  0x83   :  { %v154_v39 = vpop.xlane.xlu0 %153  ;;  %v152_v40 = vpop.xlane.xlu1 %151 }
  0x84   :  { %v163_v41 = vmul.f32 0.00390625, %v154_v39  ;;  %v150_v42 = vpop.xlane.xlu2 %149  ;;  %v162_v44 = vmul.f32 0.00390625, %v152_v40 }
  0x85   :  { %v161_v45 = vmul.f32 0.00390625, %v150_v42 }
  0x86   :  { %v375_v43 = vsel %vm196_vm0, %v163_v41, %v186_v37 }
  0x87   :  { %390 = vmatpush.msra.mxu2 %v375_v43 }
  0x8b   :  { %v184_v46 = vpop.xlane.xlu0 %183  ;;  %v182_v47 = vpop.xlane.xlu1 %181 }
  0x8c   :  { %v148_v48 = vpop.xlane.xlu2 %147  ;;  %v374_v49 = vsel %vm196_vm0, %v162_v44, %v184_v46  ;;  %v373_v51 = vsel %vm196_vm0, %v161_v45, %v182_v47 }
  0x8d   :  { %391 = vmatpush.msra.mxu2 %v374_v49  ;;  %v160_v52 = vmul.f32 0.00390625, %v148_v48 }
  0x8f   :  { %392 = vmatpush.msra.mxu2 %v373_v51 }
  0x90   :  { %546 = vmatmul.msk.f32.vlgmr.msra.gmra.mxu2 %vm201_vm1, %v191_v50 }
  0x93   :  { %v180_v53 = vpop.xlane.xlu1 %179  ;;  %v146_v54 = vpop.xlane.xlu0 %145 }
  0x94   :  { %v144_v55 = vpop.xlane.xlu2 %143  ;;  %v200_v56 = vsel %vm196_vm0, %v160_v52, %v180_v53  ;;  %v159_v57 = vmul.f32 0.00390625, %v146_v54 }
  0x95   :  { %217 = vmatpush.msra.mxu0 %v200_v56  ;;  %v158_v58 = vmul.f32 0.00390625, %v144_v55 }
  0x9b   :  { %v178_v59 = vpop.xlane.xlu0 %177  ;;  %v142_v62 = vpop.xlane.xlu1 %141 }
  0x9c   :  { %v176_v60 = vpop.xlane.xlu2 %175  ;;  %v199_v61 = vsel %vm196_vm0, %v159_v57, %v178_v59  ;;  %v157_v0 = vmul.f32 0.00390625, %v142_v62 }
  0x9d   :  { %218 = vmatpush.msra.mxu0 %v199_v61  ;;  %v198_v63 = vsel %vm196_vm0, %v158_v58, %v176_v60 }
  0x9f   :  { %219 = vmatpush.msra.mxu0 %v198_v63 }
  0xa3   :  { %v174_v1 = vpop.xlane.xlu0 %173 }
  0xa4   :  { %v197_v2 = vsel %vm196_vm0, %v157_v0, %v174_v1 }
  0xa5   :  { %220 = vmatpush.msra.mxu0 %v197_v2 }
  0xa6   :  { %536 = vmatmul.msk.f32.vlgmr.msra.gmra.mxu0 %vm201_vm1, %v191_v50 }
 0x113   :  { %v394_v3 = vpop.f32.mrf.mxu2 }
 0x114   :  { %v397_v4 = vmax.f32 %v394_v3, 0.0 }
 0x116   :  { %561 = vmatpush.msk.msra.mxu3 %vm239_vm2, %v397_v4  ;;  %547 = vmatpush.msk.msrb.mxu2 %vm239_vm2, %v397_v4 }
 0x117   :  { %549 = vmatmul.msk.f32.vlgmr.msra.gmra.mxu3 %vm226_vm3, %v193_v5  ;;  %548 = vmatmul.msk.f32.vlgmr.msrb.gmra.mxu2 %vm226_vm3, %v192_v6 }
 0x11f   :  { %550 = vmatmul.msk.f32.gmra.mxu3 %vm226_vm3, %v194_v7 }
 0x123   :  { %v222_v8 = vpop.f32.mrf.mxu0 }
 0x124   :  { %v225_v9 = vmax.f32 %v222_v8, 0.0 }
 0x126   :  { %537 = vmatpush.msk.msrb.mxu0 %vm239_vm2, %v225_v9  ;;  %560 = vmatpush.msk.msra.mxu1 %vm239_vm2, %v225_v9 }
 0x127   :  { %538 = vmatmul.msk.f32.vlgmr.msrb.gmra.mxu0 %vm226_vm3, %v192_v6  ;;  %539 = vmatmul.msk.f32.vlgmr.msra.gmra.mxu1 %vm226_vm3, %v193_v5 }
 0x128   :  { %551 = vmatmul.msk.f32.gmra.mxu3 %vm226_vm3, %v195_v10 }
 0x12f   :  { %540 = vmatmul.msk.f32.gmra.mxu1 %vm226_vm3, %v194_v7 }
 0x137   :  { %541 = vmatmul.msk.f32.gmra.mxu1 %vm226_vm3, %v195_v10 }
 0x19a   :  { %v684_v11 = vpop.f32.mrf.mxu3  ;;  %v418_v15 = vpop.f32.mrf.mxu2 }
 0x1a2   :  { %v424_v14 = vpop.f32.mrf.mxu3 }
 0x1a4   :  { %v260_v12 = vpop.f32.mrf.mxu0  ;;  %v263_v13 = vpop.f32.mrf.mxu1 }
 0x1a5   :  { %278 = vrot.lane.b32.xlu2 %v263_v13, %s627_s27  ;;  %276 = vrot.lane.b32.xlu1 %v260_v12, %s627_s27 }
 0x1ab   :  { %v686_v17 = vpop.f32.mrf.mxu3 }
 0x1ac   :  { %v266_v16 = vpop.f32.mrf.mxu1 }
 0x1ad   :  { %280 = vrot.lane.b32.xlu0 %v266_v16, %s627_s27  ;;  %434 = vrot.lane.b32.xlu1 %v418_v15, %s627_s27 }
 0x1b4   :  { %v269_v18 = vpop.f32.mrf.mxu1 }
 0x1b5   :  { %436 = vrot.lane.b32.xlu0 %v684_v11, %s627_s27  ;;  %282 = vrot.lane.b32.xlu2 %v269_v18, %s627_s27 }
 0x1b6   :  { %440 = vrot.lane.b32.xlu1 %v686_v17, %s627_s27 }
 0x1bd   :  { %438 = vrot.lane.b32.xlu2 %v424_v14, %s627_s27 }
 0x1ff   :  { %v279_v19 = vpop.permute.xlu2 %278 }
 0x200   :  { %v289_v20 = vadd.f32 %v279_v19, %v263_v13 }
 0x202   :  { %v543_v21 = vmul.f32 -1.442695, %v289_v20 }
 0x204   :  { %566 = vpow2.f32 %v543_v21 }
 0x20a   :  { %v567_v22 = vpop.eup %566 }
 0x20b   :  { %v305_v23 = vadd.f32 1.0, %v567_v22 }
 0x20d   :  { %568 = vrcp.f32 %v305_v23  ;;  %v332_v30 = vand.u32 2147483647, %v305_v23  ;;  %v334_v31 = vand.u32 2147483648, %v305_v23  ;;  %vm328_vm5 = vweird.f32 %v305_v23 }
 0x20f   :  { %v283_v24 = vpop.permute.xlu2 %282  ;;  %v335_v41 = vor.u32 1.1754944e-38, %v334_v31  ;;  %vm333_vm8 = vcmp.eq.f32.partialorder %v332_v30, 8.507059e+37 }
 0x210   :  { %v291_v25 = vadd.f32 %v283_v24, %v269_v18 }
 0x212   :  { %v545_v26 = vmul.f32 -1.442695, %v291_v25 }
 0x213   :  { %v569_v27 = vpop.eup %568 }
 0x214   :  { %v324_v28 = vmul.f32 %v569_v27, %v305_v23  ;;  %570 = vpow2.f32 %v545_v26  ;;  %vm329_vm4 = vweird.f32 %v569_v27 }
 0x215   :  { %vm330_vm7 = vmor %vm328_vm5, %vm329_vm4 }
 0x216   :  { %v325_v29 = vsub.f32 1.0, %v324_v28 }
 0x217   :  { %v439_v32 = vpop.permute.xlu2 %438  ;;  %v277_v33 = vpop.permute.xlu1 %276 }
 0x218   :  { %v326_v34 = vmul.f32 %v569_v27, %v325_v29  ;;  %v448_v35 = vadd.f32 %v439_v32, %v424_v14  ;;  %v288_v36 = vadd.f32 %v277_v33, %v260_v12 }
 0x21a   :  { %v571_v37 = vpop.eup %570  ;;  %v327_v38 = vadd.f32 %v569_v27, %v326_v34  ;;  %v554_v39 = vmul.f32 -1.442695, %v448_v35  ;;  %v542_v40 = vmul.f32 -1.442695, %v288_v36 }
 0x21b   :  { %v307_v42 = vadd.f32 1.0, %v571_v37 }
 0x21c   :  { %v331_v43 = vsel %vm330_vm7, %v569_v27, %v327_v38  ;;  %572 = vpow2.f32 %v554_v39 }
 0x21d   :  { %v336_v44 = vsel %vm333_vm8, %v335_v41, %v331_v43  ;;  %574 = vrcp.f32 %v307_v42  ;;  %v364_v58 = vand.u32 2147483648, %v307_v42  ;;  %v362_v61 = vand.u32 2147483647, %v307_v42 }
 0x21e   :  { %370 = vst.msk [vmem:[%s741_s3 + $0x8] sm:$0xff] %vm368_vm6, %v336_v44  ;;  %576 = vpow2.f32 %v542_v40  ;;  %vm358_vm10 = vweird.f32 %v307_v42 }
 0x21f   :  { %v281_v45 = vpop.permute.xlu0 %280  ;;  %v435_v46 = vpop.permute.xlu1 %434  ;;  %v365_v4 = vor.u32 1.1754944e-38, %v364_v58  ;;  %vm363_vm12 = vcmp.eq.f32.partialorder %v362_v61, 8.507059e+37 }
 0x220   :  { %v290_v47 = vadd.f32 %v281_v45, %v266_v16  ;;  %v446_v48 = vadd.f32 %v435_v46, %v418_v15 }
 0x222   :  { %v573_v49 = vpop.eup %572  ;;  %v544_v50 = vmul.f32 -1.442695, %v290_v47  ;;  %v552_v51 = vmul.f32 -1.442695, %v446_v48 }
 0x223   :  { %v575_v52 = vpop.eup %574  ;;  %v464_v53 = vadd.f32 1.0, %v573_v49 }
 0x224   :  { %v577_v54 = vpop.eup %576  ;;  %v354_v55 = vmul.f32 %v575_v52, %v307_v42  ;;  %578 = vpow2.f32 %v544_v50  ;;  %vm359_vm9 = vweird.f32 %v575_v52 }
 0x225   :  { %580 = vrcp.f32 %v464_v53  ;;  %v304_v57 = vadd.f32 1.0, %v577_v54  ;;  %vm360_vm11 = vmor %vm358_vm10, %vm359_vm9  ;;  %v507_v15 = vand.u32 2147483648, %v464_v53  ;;  %v505_v18 = vand.u32 2147483647, %v464_v53 }
 0x226   :  { %v355_v56 = vsub.f32 1.0, %v354_v55  ;;  %582 = vpow2.f32 %v552_v51  ;;  %vm501_vm14 = vweird.f32 %v464_v53 }
 0x227   :  { %v437_v59 = vpop.permute.xlu0 %436  ;;  %584 = vrcp.f32 %v304_v57  ;;  %v317_v21 = vand.u32 2147483647, %v304_v57  ;;  %v319_v22 = vand.u32 2147483648, %v304_v57  ;;  %v508_v24 = vor.u32 1.1754944e-38, %v507_v15 }
 0x228   :  { %v356_v60 = vmul.f32 %v575_v52, %v355_v56  ;;  %v441_v62 = vpop.permute.xlu1 %440  ;;  %v447_v63 = vadd.f32 %v437_v59, %v684_v11  ;;  %vm506_vm1 = vcmp.eq.f32.partialorder %v505_v18, 8.507059e+37  ;;  %vm313_vm2 = vweird.f32 %v304_v57 }
 0x229   :  { %v449_v0 = vadd.f32 %v441_v62, %v686_v17  ;;  %vm318_vm4 = vcmp.eq.f32.partialorder %v317_v21, 8.507059e+37  ;;  %v320_v34 = vor.u32 1.1754944e-38, %v319_v22 }
 0x22a   :  { %v579_v1 = vpop.eup %578  ;;  %v357_v2 = vadd.f32 %v575_v52, %v356_v60  ;;  %v553_v6 = vmul.f32 -1.442695, %v447_v63 }
 0x22b   :  { %v581_v3 = vpop.eup %580  ;;  %v696_v5 = vadd.f32 1.0, %v579_v1  ;;  %v555_v7 = vmul.f32 -1.442695, %v449_v0 }
 0x22c   :  { %v583_v8 = vpop.eup %582  ;;  %v361_v9 = vsel %vm360_vm11, %v575_v52, %v357_v2  ;;  %v497_v10 = vmul.f32 %v581_v3, %v464_v53  ;;  %vm502_vm13 = vweird.f32 %v581_v3 }
 0x22d   :  { %v366_v12 = vsel %vm363_vm12, %v365_v4, %v361_v9  ;;  %586 = vrcp.f32 %v696_v5  ;;  %v585_v11 = vpop.eup %584  ;;  %v703_v14 = vadd.f32 1.0, %v583_v8  ;;  %vm503_vm15 = vmor %vm501_vm14, %vm502_vm13  ;;  %v349_v38 = vand.u32 2147483648, %v696_v5 }
 0x22e   :  { %372 = vst.msk [vmem:[%s741_s3 + $0x18] sm:$0xff] %vm368_vm6, %v366_v12  ;;  %v498_v13 = vsub.f32 1.0, %v497_v10  ;;  %588 = vpow2.f32 %v553_v6  ;;  %v309_v16 = vmul.f32 %v585_v11, %v304_v57  ;;  %vm314_vm0 = vweird.f32 %v585_v11 }
 0x22f   :  { %590 = vpow2.f32 %v555_v7  ;;  %vm315_vm3 = vmor %vm313_vm2, %vm314_vm0  ;;  %v347_v42 = vand.u32 2147483647, %v696_v5  ;;  %vm343_vm7 = vweird.f32 %v696_v5  ;;  %v477_v45 = vand.u32 2147483648, %v703_v14 }
 0x230   :  { %v499_v17 = vmul.f32 %v581_v3, %v498_v13  ;;  %592 = vrcp.f32 %v703_v14  ;;  %v310_v19 = vsub.f32 1.0, %v309_v16  ;;  %v350_v46 = vor.u32 1.1754944e-38, %v349_v38 }
 0x231   :  { %v475_v48 = vand.u32 2147483647, %v703_v14  ;;  %vm348_vm10 = vcmp.eq.f32.partialorder %v347_v42, 8.507059e+37  ;;  %vm471_vm11 = vweird.f32 %v703_v14  ;;  %v478_v53 = vor.u32 1.1754944e-38, %v477_v45 }
 0x232   :  { %v500_v20 = vadd.f32 %v581_v3, %v499_v17  ;;  %v311_v25 = vmul.f32 %v585_v11, %v310_v19 }
 0x233   :  { %v587_v23 = vpop.eup %586  ;;  %vm476_vm13 = vcmp.eq.f32.partialorder %v475_v48, 8.507059e+37 }
 0x234   :  { %v589_v26 = vpop.eup %588  ;;  %v504_v27 = vsel %vm503_vm15, %v581_v3, %v500_v20  ;;  %v339_v28 = vmul.f32 %v587_v23, %v696_v5  ;;  %v312_v31 = vadd.f32 %v585_v11, %v311_v25  ;;  %vm344_vm5 = vweird.f32 %v587_v23 }
 0x235   :  { %v591_v29 = vpop.eup %590  ;;  %v509_v30 = vsel %vm506_vm1, %v508_v24, %v504_v27  ;;  %v463_v32 = vadd.f32 1.0, %v589_v26  ;;  %vm345_vm8 = vmor %vm343_vm7, %vm344_vm5 }
 0x236   :  { %v593_v33 = vpop.eup %592  ;;  %558 = vst.msk [vmem:[%s741_s3 + $0x30] sm:$0xff] %vm368_vm6, %v509_v30  ;;  %v340_v35 = vsub.f32 1.0, %v339_v28  ;;  %v465_v36 = vadd.f32 1.0, %v591_v29  ;;  %v316_v37 = vsel %vm315_vm3, %v585_v11, %v312_v31 }
 0x237   :  { %v467_v39 = vmul.f32 %v593_v33, %v703_v14  ;;  %594 = vrcp.f32 %v463_v32  ;;  %v321_v40 = vsel %vm318_vm4, %v320_v34, %v316_v37  ;;  %vm472_vm9 = vweird.f32 %v593_v33 }
 0x238   :  { %v341_v41 = vmul.f32 %v587_v23, %v340_v35  ;;  %369 = vst.msk [vmem:[%s741_s3] sm:$0xff] %vm368_vm6, %v321_v40  ;;  %596 = vrcp.f32 %v465_v36  ;;  %vm473_vm12 = vmor %vm471_vm11, %vm472_vm9  ;;  %v492_v60 = vand.u32 2147483648, %v463_v32  ;;  %v490_v62 = vand.u32 2147483647, %v463_v32 }
 0x239   :  { %v468_v43 = vsub.f32 1.0, %v467_v39  ;;  %vm486_vm15 = vweird.f32 %v463_v32  ;;  %v522_v0 = vand.u32 2147483648, %v465_v36  ;;  %v520_v3 = vand.u32 2147483647, %v465_v36 }
 0x23a   :  { %v342_v44 = vadd.f32 %v587_v23, %v341_v41  ;;  %v493_v4 = vor.u32 1.1754944e-38, %v492_v60  ;;  %vm491_vm2 = vcmp.eq.f32.partialorder %v490_v62, 8.507059e+37  ;;  %vm516_vm3 = vweird.f32 %v465_v36 }
 0x23b   :  { %v469_v47 = vmul.f32 %v593_v33, %v468_v43  ;;  %v523_v8 = vor.u32 1.1754944e-38, %v522_v0  ;;  %vm521_vm5 = vcmp.eq.f32.partialorder %v520_v3, 8.507059e+37 }
 0x23c   :  { %v346_v49 = vsel %vm345_vm8, %v587_v23, %v342_v44 }
 0x23d   :  { %v595_v50 = vpop.eup %594  ;;  %v351_v51 = vsel %vm348_vm10, %v350_v46, %v346_v49  ;;  %v470_v52 = vadd.f32 %v593_v33, %v469_v47 }
 0x23e   :  { %371 = vst.msk [vmem:[%s741_s3 + $0x10] sm:$0xff] %vm368_vm6, %v351_v51  ;;  %v482_v54 = vmul.f32 %v595_v50, %v463_v32  ;;  %v597_v55 = vpop.eup %596  ;;  %vm487_vm14 = vweird.f32 %v595_v50 }
 0x23f   :  { %v474_v56 = vsel %vm473_vm12, %v593_v33, %v470_v52  ;;  %v512_v59 = vmul.f32 %v597_v55, %v465_v36  ;;  %vm517_vm0 = vweird.f32 %v597_v55  ;;  %vm488_vm1 = vmor %vm486_vm15, %vm487_vm14 }
 0x240   :  { %v479_v57 = vsel %vm476_vm13, %v478_v53, %v474_v56  ;;  %v483_v58 = vsub.f32 1.0, %v482_v54  ;;  %vm518_vm4 = vmor %vm516_vm3, %vm517_vm0 }
 0x241   :  { %556 = vst.msk [vmem:[%s741_s3 + $0x20] sm:$0xff] %vm368_vm6, %v479_v57  ;;  %v513_v63 = vsub.f32 1.0, %v512_v59 }
 0x242   :  { %v484_v61 = vmul.f32 %v595_v50, %v483_v58 }
 0x243   :  { %v514_v2 = vmul.f32 %v597_v55, %v513_v63 }
 0x244   :  { %v485_v1 = vadd.f32 %v595_v50, %v484_v61 }
 0x245   :  { %v515_v6 = vadd.f32 %v597_v55, %v514_v2 }
 0x246   :  { %v489_v5 = vsel %vm488_vm1, %v595_v50, %v485_v1 }
 0x247   :  { %v494_v7 = vsel %vm491_vm2, %v493_v4, %v489_v5  ;;  %v519_v9 = vsel %vm518_vm4, %v597_v55, %v515_v6 }
 0x248   :  { %557 = vst.msk [vmem:[%s741_s3 + $0x28] sm:$0xff] %vm368_vm6, %v494_v7  ;;  %v524_v10 = vsel %vm521_vm5, %v523_v8, %v519_v9 }
 0x249   :  { %559 = vst.msk [vmem:[%s741_s3 + $0x38] sm:$0xff] %vm368_vm6, %v524_v10 }
 0x24a   :  { %535 = vsyncpa [#allocation5], 1 }

</bundles_post_ra>
